<compile_context>
chip_gen: v7x
topology: tpu7x:2x2x1
jax: 0.10.0
libtpu: 0.0.40
codegen_flags: <defaults>
</compile_context>

<pallas_src>
import jax
import jax.numpy as jnp
from jax.experimental import pallas as pl
from jax.experimental.pallas import tpu as pltpu


def _round_up(v, m):
    return (v + m - 1) // m * m


# --------------------------- per-generation parameters ---------------------------

def _tpu_generation():
    try:
        kind = jax.devices()[0].device_kind.lower()
    except Exception:
        kind = ""
    for g in ("v7", "v6", "v5"):
        if g in kind:
            return g
    return "unknown"


def _hw_params():
    gen = _tpu_generation()
    if gen == "v5":
        # 4x128x128 MXU, 128 MiB VMEM/TC
        return {"lane_align": 128, "vmem_budget": 96 * 1024 * 1024}
    if gen == "v6":
        # 2x256x256 MXU, 128 MiB VMEM/TC
        return {"lane_align": 256, "vmem_budget": 96 * 1024 * 1024}
    if gen == "v7":
        # 2x256x256 MXU, only 64 MiB VMEM/TC -> leave headroom, never ask for all of it
        return {"lane_align": 256, "vmem_budget": 48 * 1024 * 1024}
    # Unknown / emulated: conservative defaults.
    return {"lane_align": 128, "vmem_budget": 48 * 1024 * 1024}


# --------------------------------- kernels ----------------------------------------

def ffn_resident_kernel(x_ref, w1_ref, b1_ref, w2_ref, b2_ref, o_ref):
    # Weights/biases are VMEM-resident (constant index_map); grid is over token tiles.
    h = jnp.dot(x_ref[...], w1_ref[...], preferred_element_type=jnp.float32)
    h = jnp.maximum(h + b1_ref[...], 0.0)
    # dropout -> identity (eval mode)
    o = jnp.dot(h.astype(w2_ref.dtype), w2_ref[...], preferred_element_type=jnp.float32)
    o_ref[...] = (o + b2_ref[...]).astype(o_ref.dtype)


def ffn_streaming_kernel(x_ref, w1_ref, b1_ref, w2_ref, b2_ref, o_ref, acc_ref):
    # d_ff is streamed as the last ("arbitrary") grid axis; acc_ref is an f32 scratch.
    k = pl.program_id(1)

    h = jnp.dot(x_ref[...], w1_ref[...], preferred_element_type=jnp.float32)
    h = jnp.maximum(h + b1_ref[...], 0.0)
    # dropout -> identity (eval mode)
    p = jnp.dot(h.astype(w2_ref.dtype), w2_ref[...], preferred_element_type=jnp.float32)

    @pl.when(k == 0)
    def _():
        acc_ref[...] = p          # direct write: no zero-init store + reload

    @pl.when(k > 0)
    def _():
        acc_ref[...] += p

    @pl.when(k == pl.num_programs(1) - 1)
    def _():
        o_ref[...] = (acc_ref[...] + b2_ref[...]).astype(o_ref.dtype)


# ------------------------------- planning helpers ---------------------------------

def _largest_divisor_tile(total, align, cap):
    """Largest multiple of `align` that divides `total` and is <= cap (>= align)."""
    best = align
    t = align
    while t <= min(total, cap):
        if total % t == 0:
            best = t
        t += align
    return best


def _resident_plan(n_tokens, d_model_p, d_ff_p, c_b, o_b, budget, tm_max):
    """Return tm for the weight-resident plan, or None if it does not fit."""
    # Conservative: assume the pipeline still allocates double buffers for the
    # (constant-index) weight blocks.
    weight_bytes = 2 * 2 * c_b * d_model_p * d_ff_p
    bias_bytes = 2 * 4 * (d_ff_p + d_model_p)
    fixed = weight_bytes + bias_bytes + (2 << 20)          # + compiler headroom
    if fixed >= budget:
        return None
    # Per token row: x (x2 buf) + out (x2 buf) + f32 out temp + f32 h + bf16 h.
    per_row = d_model_p * (2 * c_b + 2 * o_b + 4) + d_ff_p * (4 + c_b)
    tm = (budget - fixed) // per_row
    tm = min(tm, tm_max, _round_up(n_tokens, 8))
    tm = (tm // 8) * 8
    if tm < 8:
        return None
    # Residency only pays off with reasonably tall token tiles (unless N itself is tiny).
    if tm < min(128, _round_up(n_tokens, 8)):
        return None
    return tm


def _streaming_plan(n_tokens, d_model_p, d_ff_p, c_b, o_b, budget, tm_max, tf_max, align):
    """Return (tm, tf) for the d_ff-streaming plan."""
    n_round = _round_up(n_tokens, 8)
    tf = _largest_divisor_tile(d_ff_p, align, tf_max)
    while True:
        # W1/W2 chunks (double-buffered) + biases + headroom.
        fixed = 2 * 2 * c_b * d_model_p * tf + 2 * 4 * (tf + d_model_p) + (2 << 20)
        # x (x2), out (x2), f32 acc, f32 out temp, f32 h, bf16 h.
        per_row = d_model_p * (2 * c_b + 2 * o_b + 4 + 4) + tf * (4 + c_b)
        tm = (budget - fixed) // per_row if budget > fixed else 0
        tm = min(tm, tm_max, n_round)
        tm = (tm // 8) * 8
        if tm >= 8:
            return tm, tf
        if tf == align:
            return 8, align
        tf = _largest_divisor_tile(d_ff_p, align, tf - align)


# ----------------------------- parameter preparation ------------------------------

def prepare_ffn_params(w1, b1, w2, b2, *, compute_dtype=jnp.bfloat16, lane_align=None):
    """Pad + cast the FFN weights ONCE (hoisted out of the per-call path).

    w1: [d_model, d_ff], b1: [d_ff], w2: [d_ff, d_model], b2: [d_model]
    (weights stored transposed vs. PyTorch nn.Linear, i.e. [in, out]).
    """
    if lane_align is None:
        lane_align = _hw_params()["lane_align"]
    d_model, d_ff = w1.shape
    d_model_p = _round_up(d_model, lane_align)
    d_ff_p = _round_up(d_ff, lane_align)
    w1p = jnp.pad(w1, ((0, d_model_p - d_model), (0, d_ff_p - d_ff))).astype(compute_dtype)
    w2p = jnp.pad(w2, ((0, d_ff_p - d_ff), (0, d_model_p - d_model))).astype(compute_dtype)
    b1p = jnp.pad(b1, (0, d_ff_p - d_ff)).reshape(1, d_ff_p).astype(jnp.float32)
    b2p = jnp.pad(b2, (0, d_model_p - d_model)).reshape(1, d_model_p).astype(jnp.float32)
    return {
        "w1": w1p, "b1": b1p, "w2": w2p, "b2": b2p,
        "d_model": d_model, "d_ff": d_ff,
        "d_model_p": d_model_p, "d_ff_p": d_ff_p,
        "compute_dtype": compute_dtype,
    }


# ----------------------------------- wrapper ---------------------------------------

def token_level_feed_forward(x, params, *, tm_max=1024, tf_max=1024):
    """x: [B, S, d_model] -> [B, S, d_model] using pre-padded params from
    prepare_ffn_params()."""
    B, S, d_model = x.shape
    assert d_model == params["d_model"], "d_model mismatch vs. prepared params"
    d_model_p = params["d_model_p"]
    d_ff_p = params["d_ff_p"]
    cdt = params["compute_dtype"]
    out_dtype = x.dtype
    N = B * S

    hw = _hw_params()
    budget = hw["vmem_budget"]
    align = hw["lane_align"]
    c_b = jnp.dtype(cdt).itemsize
    o_b = jnp.dtype(out_dtype).itemsize

    tm_res = _resident_plan(N, d_model_p, d_ff_p, c_b, o_b, budget, tm_max)

    if tm_res is not None:
        # ---------------- resident-weight plan: grid over token tiles only ----------
        tm = tm_res
        n_p = _round_up(N, tm)
        x2d = jnp.pad(x.reshape(N, d_model),
                      ((0, n_p - N), (0, d_model_p - d_model))).astype(cdt)
        out2d = pl.pallas_call(
            ffn_resident_kernel,
            out_shape=jax.ShapeDtypeStruct((n_p, d_model_p), out_dtype),
            grid_spec=pltpu.PrefetchScalarGridSpec(
                num_scalar_prefetch=0,
                grid=(n_p // tm,),
                in_specs=[
                    pl.BlockSpec((tm, d_model_p), lambda i: (i, 0)),        # x tile
                    pl.BlockSpec((d_model_p, d_ff_p), lambda i: (0, 0)),    # W1 (resident)
                    pl.BlockSpec((1, d_ff_p), lambda i: (0, 0)),            # b1 (resident)
                    pl.BlockSpec((d_ff_p, d_model_p), lambda i: (0, 0)),    # W2 (resident)
                    pl.BlockSpec((1, d_model_p), lambda i: (0, 0)),         # b2 (resident)
                ],
                out_specs=pl.BlockSpec((tm, d_model_p), lambda i: (i, 0)),
            ),
            compiler_params=pltpu.CompilerParams(
                dimension_semantics=("parallel",),
                vmem_limit_bytes=budget,
            ),
        )(x2d, params["w1"], params["b1"], params["w2"], params["b2"])
    else:
        # ---------------- streaming plan: d_ff is the reduction grid axis -----------
        tm, tf = _streaming_plan(N, d_model_p, d_ff_p, c_b, o_b, budget,
                                 tm_max, tf_max, align)
        n_p = _round_up(N, tm)
        x2d = jnp.pad(x.reshape(N, d_model),
                      ((0, n_p - N), (0, d_model_p - d_model))).astype(cdt)
        out2d = pl.pallas_call(
            ffn_streaming_kernel,
            out_shape=jax.ShapeDtypeStruct((n_p, d_model_p), out_dtype),
            grid_spec=pltpu.PrefetchScalarGridSpec(
                num_scalar_prefetch=0,
                grid=(n_p // tm, d_ff_p // tf),
                in_specs=[
                    pl.BlockSpec((tm, d_model_p), lambda i, k: (i, 0)),   # x tile
                    pl.BlockSpec((d_model_p, tf), lambda i, k: (0, k)),   # W1 column chunk
                    pl.BlockSpec((1, tf), lambda i, k: (0, k)),           # b1 chunk
                    pl.BlockSpec((tf, d_model_p), lambda i, k: (k, 0)),   # W2 row chunk
                    pl.BlockSpec((1, d_model_p), lambda i, k: (0, 0)),    # b2 (constant)
                ],
                out_specs=pl.BlockSpec((tm, d_model_p), lambda i, k: (i, 0)),
                scratch_shapes=[pltpu.VMEM((tm, d_model_p), jnp.float32)],
            ),
            compiler_params=pltpu.CompilerParams(
                dimension_semantics=("parallel", "arbitrary"),
                vmem_limit_bytes=budget,
            ),
        )(x2d, params["w1"], params["b1"], params["w2"], params["b2"])

    return out2d[:N, :d_model].reshape(B, S, d_model)


# ------------------------------------ demo -----------------------------------------

def init_params(key, d_model, d_ff, dtype=jnp.float32):
    """Deterministic init mimicking nn.Linear's U(-1/sqrt(fan_in), 1/sqrt(fan_in))."""
    k1, k2, k3, k4 = jax.random.split(key, 4)
    bound1 = 1.0 / (d_model ** 0.5)
    bound2 = 1.0 / (d_ff ** 0.5)
    # Stored already transposed vs. PyTorch: [in, out]
    w1 = jax.random.uniform(k1, (d_model, d_ff), dtype, -bound1, bound1)
    b1 = jax.random.uniform(k2, (d_ff,), dtype, -bound1, bound1)
    w2 = jax.random.uniform(k3, (d_ff, d_model), dtype, -bound2, bound2)
    b2 = jax.random.uniform(k4, (d_model,), dtype, -bound2, bound2)
    return w1, b1, w2, b2


if __name__ == "__main__":
    key = jax.random.PRNGKey(0)
    # Small demo shapes; real usage (d_model>=1024, d_ff>=4096, N in the thousands)
    # exercises the same two plans with large tm and resident / streamed weights.
    B, S, d_model, d_ff = 2, 8, 128, 512

    kx, kp = jax.random.split(key)
    x = jax.random.normal(kx, (B, S, d_model), jnp.float32)
    w1, b1, w2, b2 = init_params(kp, d_model, d_ff)

    # Pad + cast the weights once (hoisted out of the per-call path).
    params = prepare_ffn_params(w1, b1, w2, b2)

    out = token_level_feed_forward(x, params)
    out = jax.block_until_ready(out)

    # Reference in plain JAX f32 (kernel uses bf16 matmul inputs with f32 accumulation).
    ref = jnp.maximum(x @ w1 + b1, 0.0) @ w2 + b2
    assert out.shape == (B, S, d_model)
    assert jnp.allclose(out, ref, atol=5e-2, rtol=5e-2), "mismatch vs reference"

    print("KERNEL_OK")
</pallas_src>

<mosaic_0001>
module attributes {stable_mosaic.version = 11 : i64} {
  func.func @ffn_resident_kernel(%arg0: i32, %arg1: memref<16x128xbf16, #tpu.memory_space<vmem>>, %arg2: memref<128x512xbf16, #tpu.memory_space<vmem>>, %arg3: memref<1x512xf32, #tpu.memory_space<vmem>>, %arg4: memref<512x128xbf16, #tpu.memory_space<vmem>>, %arg5: memref<1x128xf32, #tpu.memory_space<vmem>>, %arg6: memref<16x128xf32, #tpu.memory_space<vmem>>) attributes {dimension_semantics = [#tpu.dimension_semantics<parallel>], iteration_bounds = array<i64: 1>, scalar_prefetch = 0 : i64, scratch_operands = 0 : i64, tpu.core_type = #tpu.core_type<tc>, window_params = [{transform_indices = @transform_0, window_bounds = array<i64: 16, 128>}, {pipeline_mode = #tpu.pipeline_mode<synchronous>, transform_indices = @transform_1, window_bounds = array<i64: 128, 512>}, {pipeline_mode = #tpu.pipeline_mode<synchronous>, transform_indices = @transform_2, window_bounds = array<i64: 1, 512>}, {pipeline_mode = #tpu.pipeline_mode<synchronous>, transform_indices = @transform_3, window_bounds = array<i64: 512, 128>}, {pipeline_mode = #tpu.pipeline_mode<synchronous>, transform_indices = @transform_4, window_bounds = array<i64: 1, 128>}, {transform_indices = @transform_5, window_bounds = array<i64: 16, 128>}]} {
    %c0 = arith.constant 0 : index
    %c0_0 = arith.constant 0 : index
    %0 = vector.load %arg1[%c0, %c0_0] : memref<16x128xbf16, #tpu.memory_space<vmem>>, vector<16x128xbf16>
    %c0_1 = arith.constant 0 : index
    %c0_2 = arith.constant 0 : index
    %1 = vector.load %arg2[%c0_1, %c0_2] : memref<128x512xbf16, #tpu.memory_space<vmem>>, vector<128x512xbf16>
    %cst = arith.constant dense<0.000000e+00> : vector<16x512xf32>
    %2 = tpu.matmul %0, %1, %cst {dimension_numbers = #tpu.dot_dimension_numbers<[1], [0], [0], [1], [0, 0, 1, 1], [], []>} : vector<16x128xbf16>, vector<128x512xbf16>, vector<16x512xf32> -> vector<16x512xf32>
    %c0_3 = arith.constant 0 : index
    %c0_4 = arith.constant 0 : index
    %3 = vector.load %arg3[%c0_3, %c0_4] : memref<1x512xf32, #tpu.memory_space<vmem>>, vector<1x512xf32>
    %4 = vector.broadcast %3 : vector<1x512xf32> to vector<16x512xf32>
    %5 = arith.addf %2, %4 : vector<16x512xf32>
    %cst_5 = arith.constant 0.000000e+00 : f32
    %6 = vector.broadcast %cst_5 : f32 to vector<16x512xf32>
    %7 = arith.maximumf %5, %6 : vector<16x512xf32>
    %8 = arith.truncf %7 : vector<16x512xf32> to vector<16x512xbf16>
    %c0_6 = arith.constant 0 : index
    %c0_7 = arith.constant 0 : index
    %9 = vector.load %arg4[%c0_6, %c0_7] : memref<512x128xbf16, #tpu.memory_space<vmem>>, vector<512x128xbf16>
    %cst_8 = arith.constant dense<0.000000e+00> : vector<16x128xf32>
    %10 = tpu.matmul %8, %9, %cst_8 {dimension_numbers = #tpu.dot_dimension_numbers<[1], [0], [0], [1], [0, 0, 1, 1], [], []>} : vector<16x512xbf16>, vector<512x128xbf16>, vector<16x128xf32> -> vector<16x128xf32>
    %c0_9 = arith.constant 0 : index
    %c0_10 = arith.constant 0 : index
    %11 = vector.load %arg5[%c0_9, %c0_10] : memref<1x128xf32, #tpu.memory_space<vmem>>, vector<1x128xf32>
    %12 = vector.broadcast %11 : vector<1x128xf32> to vector<16x128xf32>
    %13 = arith.addf %10, %12 : vector<16x128xf32>
    %c0_11 = arith.constant 0 : index
    %c0_12 = arith.constant 0 : index
    %14 = vector.load %arg6[%c0_11, %c0_12] : memref<16x128xf32, #tpu.memory_space<vmem>>, vector<16x128xf32>
    tpu.vector_store %arg6[%c0_11, %c0_12], %13 {strides = array<i32>} : memref<16x128xf32, #tpu.memory_space<vmem>>, vector<16x128xf32>,
    return
  }
  func.func @transform_0(%arg0: i32) -> (i32, i32) {
    %c0_i32 = arith.constant 0 : i32
    %c0_i32_0 = arith.constant 0 : i32
    return %arg0, %c0_i32 : i32, i32
  }
  func.func @transform_1(%arg0: i32) -> (i32, i32) {
    %c0_i32 = arith.constant 0 : i32
    %c0_i32_0 = arith.constant 0 : i32
    %c0_i32_1 = arith.constant 0 : i32
    return %c0_i32, %c0_i32_0 : i32, i32
  }
  func.func @transform_2(%arg0: i32) -> (i32, i32) {
    %c0_i32 = arith.constant 0 : i32
    %c0_i32_0 = arith.constant 0 : i32
    %c0_i32_1 = arith.constant 0 : i32
    return %c0_i32, %c0_i32_0 : i32, i32
  }
  func.func @transform_3(%arg0: i32) -> (i32, i32) {
    %c0_i32 = arith.constant 0 : i32
    %c0_i32_0 = arith.constant 0 : i32
    %c0_i32_1 = arith.constant 0 : i32
    return %c0_i32, %c0_i32_0 : i32, i32
  }
  func.func @transform_4(%arg0: i32) -> (i32, i32) {
    %c0_i32 = arith.constant 0 : i32
    %c0_i32_0 = arith.constant 0 : i32
    %c0_i32_1 = arith.constant 0 : i32
    return %c0_i32, %c0_i32_0 : i32, i32
  }
  func.func @transform_5(%arg0: i32) -> (i32, i32) {
    %c0_i32 = arith.constant 0 : i32
    %c0_i32_0 = arith.constant 0 : i32
    return %arg0, %c0_i32 : i32, i32
  }
}

</mosaic_0001>

<bundles_post_ra>
// kernel: tpu_custom_call.1
= control target key start
LH: loop header
LB: loop body
LE: loop exit
PB: predicated region body
PF: predicated region fallthrough
CT: control target
= control target key end

     0   :  { %10 = vsyncpa [#allocation3], 0  ;;  %s1139_s0 = inlined_call_operand.hbm [shape: bf16[16,128], index: 0, kind: input, shape index: {}]   ;;  %s1140_s1 = inlined_call_operand.hbm [shape: bf16[128,512], index: 1, kind: input, shape index: {}]   ;;  %s1141_s2 = inlined_call_operand.vmem [shape: f32[1,512], index: 2, kind: input, shape index: {}]   ;;  %s1142_s3 = inlined_call_operand.hbm [shape: bf16[512,128], index: 3, kind: input, shape index: {}]   ;;  %s1143_s4 = inlined_call_operand.vmem [shape: f32[1,128], index: 4, kind: input, shape index: {}]   ;;  %s1144_s5 = inlined_call_operand.hbm [shape: f32[16,128], index: 5, kind: output, shape index: {}]  }
   0x1   :  { %11 = vsyncpa [#allocation6], 0 }
   0x2   :  { %12 = vsyncpa [#allocation4], 0  ;;  %s1044_s18 = smov [#allocation5]   ;;  %s950_s22 = scalar_lea.hbm %s1140_s1, 4096 }
   0x3   :  { %s30_s19 = sshll.u32 %s1044_s18, 4  ;;  %p951_p0 = scmp.ne.s32.totalorder %s1140_s1, %s950_s22  ;;  %s31_s19 = int_to_ptr.vmem [resolvable:$true] %s30_s19 }
   0x4   :  { %p954_p1 = scmp.lt.u32.totalorder %s950_s22, %s1140_s1 }
   0x6   :  { %p956_p2 = pnand %p954_p1, %p951_p0 }
   0x8   :  { %959 = shalt.err (!%p956_p2)
}
   0x9   :  { %s960_s27 = scalar_lea.vmem %s31_s19, 4096  ;;  %p965_p4 = scmp.lt.s32.totalorder %s31_s19, %s31_s19 }
   0xa   :  { %p961_p3 = scmp.ne.s32.totalorder %s31_s19, %s960_s27  ;;  %p966_p5 = scmp.lt.s32.totalorder %s960_s27, %s960_s27 }
   0xc   :  { %p967_p6 = por %p966_p5, %p965_p4 }
   0xe   :  { %p968_p7 = pnand %p967_p6, %p961_p3 }
  0x10   :  { %971 = shalt.err (!%p968_p7)
}
  0x11   :  { %s1045_s28 = smov 256   ;;  %s1046_s29 = smov 16  }
  0x12   :  { %36 = dma.hbm_to_vmem [thread:$0]  %s1140_s1, 4096, %s31_s19, [#allocation6], %s1045_s28, %s1045_s28, %s1046_s29  }
  0x13   :  { %s1047_s7 = smov [#allocation2]   ;;  %s972_s11 = scalar_lea.hbm %s1139_s0, 128 }
  0x14   :  { %s18_s8 = sshll.u32 %s1047_s7, 4  ;;  %p973_p8 = scmp.ne.s32.totalorder %s1139_s0, %s972_s11  ;;  %s19_s8 = int_to_ptr.vmem [resolvable:$true] %s18_s8 }
  0x15   :  { %p976_p9 = scmp.lt.u32.totalorder %s972_s11, %s1139_s0 }
  0x17   :  { %p978_p10 = pnand %p976_p9, %p973_p8 }
  0x19   :  { %981 = shalt.err (!%p978_p10)
}
  0x1a   :  { %s982_s16 = scalar_lea.vmem %s19_s8, 128  ;;  %p987_p12 = scmp.lt.s32.totalorder %s19_s8, %s19_s8 }
  0x1b   :  { %p983_p11 = scmp.ne.s32.totalorder %s19_s8, %s982_s16  ;;  %p988_p13 = scmp.lt.s32.totalorder %s982_s16, %s982_s16 }
  0x1d   :  { %p989_p0 = por %p988_p13, %p987_p12 }
  0x1f   :  { %p990_p1 = pnand %p989_p0, %p983_p11 }
  0x21   :  { %993 = shalt.err (!%p990_p1)
}
  0x22   :  { %s1048_s1 = smov 64   ;;  %s1049_s17 = smov 4  }
  0x23   :  { %24 = dma.hbm_to_vmem [thread:$0]  %s1139_s0, 128, %s19_s8, [#allocation3], %s1048_s1, %s1048_s1, %s1049_s17  }
  0x24   :  { %s1050_s20 = smov [#allocation7]   ;;  %s994_s24 = scalar_lea.hbm %s1142_s3, 4096 }
  0x25   :  { %s44_s21 = sshll.u32 %s1050_s20, 4  ;;  %p995_p2 = scmp.ne.s32.totalorder %s1142_s3, %s994_s24  ;;  %s45_s21 = int_to_ptr.vmem [resolvable:$true] %s44_s21 }
  0x26   :  { %p998_p3 = scmp.lt.u32.totalorder %s994_s24, %s1142_s3 }
  0x28   :  { %p1000_p4 = pnand %p998_p3, %p995_p2 }
  0x2a   :  { %1003 = shalt.err (!%p1000_p4)
}
  0x2b   :  { %s1004_s29 = scalar_lea.vmem %s45_s21, 4096  ;;  %p1009_p6 = scmp.lt.s32.totalorder %s45_s21, %s45_s21 }
  0x2c   :  { %p1005_p5 = scmp.ne.s32.totalorder %s45_s21, %s1004_s29  ;;  %p1010_p7 = scmp.lt.s32.totalorder %s1004_s29, %s1004_s29 }
  0x2e   :  { %p1011_p8 = por %p1010_p7, %p1009_p6 }
  0x30   :  { %p1012_p9 = pnand %p1011_p8, %p1005_p5 }
  0x32   :  { %1015 = shalt.err (!%p1012_p9)
}
  0x33   :  { %50 = dma.hbm_to_vmem [thread:$0]  %s1142_s3, 4096, %s45_s21, [#allocation6], %s1048_s1, %s1048_s1, %s1049_s17  }
  0x34   :  { %1038 = dma.done.wait [#allocation3], 128  }
  0x35   :  { %1039 = vsyncadd [#allocation3], 4294967168 }
  0x36   :  { %1040 = dma.done.wait [#allocation6], 8192  }
  0x37   :  { %1041 = vsyncadd [#allocation6], 4294959104  ;;  %v1051_v0 = vmov 0   ;;  %v869_v1 = vld [vmem:[#allocation5 + $0x4] ss:$16 sps:$4 sm:$0xff]   ;;  %v917_v34 = vld [vmem:[#allocation2] sm:$0xff]  }
  0x38   :  { %317 = vmatprep.mubr.bf16.mxu0 %v1051_v0  ;;  %360 = vmatprep.mubr.bf16.mxu1 %v1051_v0  ;;  %v871_v2 = vld [vmem:[#allocation5 + $0xc] ss:$16 sps:$4 sm:$0xff]   ;;  %v873_v3 = vld [vmem:[#allocation5] ss:$16 sps:$4 sm:$0xff]   ;;  %v874_v4 = vld [vmem:[#allocation5 + $0x8] ss:$16 sps:$4 sm:$0xff]  }
  0x39   :  { %285 = vmatprep.subr.bf16.mxu0 %v869_v1  ;;  %328 = vmatprep.subr.bf16.mxu1 %v871_v2  ;;  %v875_v5 = vld [vmem:[#allocation5 + $0x24] ss:$16 sps:$4 sm:$0xff]   ;;  %v877_v6 = vld [vmem:[#allocation5 + $0x2c] ss:$16 sps:$4 sm:$0xff]   ;;  %v879_v7 = vld [vmem:[#allocation5 + $0x20] ss:$16 sps:$4 sm:$0xff]   ;;  %v99_v2 = vlaneseq }
  0x3a   :  { %286 = vmatpush1.bf16.msra.mxu0 %v873_v3  ;;  %329 = vmatpush1.bf16.msra.mxu1 %v874_v4  ;;  %v880_v8 = vld [vmem:[#allocation5 + $0x28] ss:$16 sps:$4 sm:$0xff]   ;;  %v881_v9 = vld [vmem:[#allocation5 + $0x44] ss:$16 sps:$4 sm:$0xff]   ;;  %v883_v10 = vld [vmem:[#allocation5 + $0x4c] ss:$16 sps:$4 sm:$0xff]  }
  0x3b   :  { %287 = vmatprep.subr.bf16.mxu0 %v875_v5  ;;  %330 = vmatprep.subr.bf16.mxu1 %v877_v6  ;;  %v885_v11 = vld [vmem:[#allocation5 + $0x40] ss:$16 sps:$4 sm:$0xff]   ;;  %v886_v12 = vld [vmem:[#allocation5 + $0x48] ss:$16 sps:$4 sm:$0xff]   ;;  %v887_v13 = vld [vmem:[#allocation5 + $0x64] ss:$16 sps:$4 sm:$0xff]  }
  0x3c   :  { %v889_v14 = vld [vmem:[#allocation5 + $0x6c] ss:$16 sps:$4 sm:$0xff]   ;;  %v891_v15 = vld [vmem:[#allocation5 + $0x60] ss:$16 sps:$4 sm:$0xff]   ;;  %v892_v16 = vld [vmem:[#allocation5 + $0x68] ss:$16 sps:$4 sm:$0xff]  }
  0x3d   :  { %v893_v17 = vld [vmem:[#allocation5 + $0x84] ss:$16 sps:$4 sm:$0xff]   ;;  %v895_v18 = vld [vmem:[#allocation5 + $0x8c] ss:$16 sps:$4 sm:$0xff]   ;;  %v897_v19 = vld [vmem:[#allocation5 + $0x80] ss:$16 sps:$4 sm:$0xff]  }
  0x3e   :  { %288 = vmatpush1.bf16.msra.mxu0 %v879_v7  ;;  %331 = vmatpush1.bf16.msra.mxu1 %v880_v8  ;;  %v898_v20 = vld [vmem:[#allocation5 + $0x88] ss:$16 sps:$4 sm:$0xff]   ;;  %v899_v21 = vld [vmem:[#allocation5 + $0xa4] ss:$16 sps:$4 sm:$0xff]   ;;  %v901_v22 = vld [vmem:[#allocation5 + $0xac] ss:$16 sps:$4 sm:$0xff]  }
  0x3f   :  { %289 = vmatprep.subr.bf16.mxu0 %v881_v9  ;;  %332 = vmatprep.subr.bf16.mxu1 %v883_v10  ;;  %v903_v23 = vld [vmem:[#allocation5 + $0xa0] ss:$16 sps:$4 sm:$0xff]   ;;  %v904_v24 = vld [vmem:[#allocation5 + $0xa8] ss:$16 sps:$4 sm:$0xff]   ;;  %v905_v25 = vld [vmem:[#allocation5 + $0xc4] ss:$16 sps:$4 sm:$0xff]  }
  0x40   :  { %v907_v26 = vld [vmem:[#allocation5 + $0xcc] ss:$16 sps:$4 sm:$0xff]   ;;  %v909_v27 = vld [vmem:[#allocation5 + $0xc0] ss:$16 sps:$4 sm:$0xff]   ;;  %v910_v28 = vld [vmem:[#allocation5 + $0xc8] ss:$16 sps:$4 sm:$0xff]  }
  0x41   :  { %v911_v29 = vld [vmem:[#allocation5 + $0xe4] ss:$16 sps:$4 sm:$0xff]   ;;  %v913_v30 = vld [vmem:[#allocation5 + $0xec] ss:$16 sps:$4 sm:$0xff]   ;;  %v915_v31 = vld [vmem:[#allocation5 + $0xe0] ss:$16 sps:$4 sm:$0xff]  }
  0x42   :  { %290 = vmatpush1.bf16.msra.mxu0 %v885_v11  ;;  %333 = vmatpush1.bf16.msra.mxu1 %v886_v12  ;;  %v916_v32 = vld [vmem:[#allocation5 + $0xe8] ss:$16 sps:$4 sm:$0xff]   ;;  %v918_v33 = vld [vmem:[#allocation7 + $0x40] sm:$0xff]   ;;  %v926_v42 = vld [vmem:[#allocation7 + $0x50] sm:$0xff]   ;;  %v100_v3 = vshrl.u32 %v99_v2, 7  ;;  %s1052_s8 = smov [#allocation8]  }
  0x43   :  { %291 = vmatprep.subr.bf16.mxu0 %v887_v13  ;;  %334 = vmatprep.subr.bf16.mxu1 %v889_v14  ;;  %v919_v35 = vld [vmem:[#allocation7 + $0xc0] sm:$0xff]   ;;  %v922_v38 = vld [vmem:[#allocation7 + $0x48] sm:$0xff]   ;;  %v927_v43 = vld [vmem:[#allocation7 + $0xd0] sm:$0xff]   ;;  %s735_s9 = sshll.u32 %s1052_s8, 4  ;;  %s736_s9 = int_to_ptr.vmem [resolvable:$true] %s735_s9 }
  0x44   :  { %v920_v36 = vld [vmem:[#allocation7] sm:$0xff]   ;;  %v923_v39 = vld [vmem:[#allocation7 + $0xc8] sm:$0xff]   ;;  %v928_v44 = vld [vmem:[#allocation7 + $0x10] sm:$0xff]   ;;  %v101_v4 = vsub.s32 0, %v100_v3  ;;  %v109_v5 = vsub.s32 2, %v100_v3  ;;  %v105_v7 = vsub.s32 1, %v100_v3  ;;  %p1021_p11 = scmp.lt.s32.totalorder %s736_s9, %s736_s9 }
  0x45   :  { %v921_v37 = vld [vmem:[#allocation7 + $0x80] sm:$0xff]   ;;  %v924_v40 = vld [vmem:[#allocation7 + $0x8] sm:$0xff]   ;;  %v929_v45 = vld [vmem:[#allocation7 + $0x90] sm:$0xff]   ;;  %v113_v8 = vsub.s32 3, %v100_v3 }
  0x46   :  { %292 = vmatpush1.bf16.msra.mxu0 %v891_v15  ;;  %335 = vmatpush1.bf16.msra.mxu1 %v892_v16  ;;  %v925_v41 = vld [vmem:[#allocation7 + $0x88] sm:$0xff]   ;;  %v930_v46 = vld [vmem:[#allocation7 + $0x58] sm:$0xff]   ;;  %v934_v50 = vld [vmem:[#allocation7 + $0x60] sm:$0xff]  }
  0x47   :  { %293 = vmatprep.subr.bf16.mxu0 %v893_v17  ;;  %336 = vmatprep.subr.bf16.mxu1 %v895_v18  ;;  %v931_v47 = vld [vmem:[#allocation7 + $0xd8] sm:$0xff]   ;;  %v935_v51 = vld [vmem:[#allocation7 + $0xe0] sm:$0xff]   ;;  %v938_v54 = vld [vmem:[#allocation7 + $0x68] sm:$0xff]  }
  0x48   :  { %v932_v48 = vld [vmem:[#allocation7 + $0x18] sm:$0xff]   ;;  %v936_v52 = vld [vmem:[#allocation7 + $0x20] sm:$0xff]   ;;  %v939_v55 = vld [vmem:[#allocation7 + $0xe8] sm:$0xff]  }
  0x49   :  { %v933_v49 = vld [vmem:[#allocation7 + $0x98] sm:$0xff]   ;;  %v937_v53 = vld [vmem:[#allocation7 + $0xa0] sm:$0xff]   ;;  %v940_v56 = vld [vmem:[#allocation7 + $0x28] sm:$0xff]  }
  0x4a   :  { %294 = vmatpush1.bf16.msra.mxu0 %v897_v19  ;;  %337 = vmatpush1.bf16.msra.mxu1 %v898_v20  ;;  %v941_v57 = vld [vmem:[#allocation7 + $0xa8] sm:$0xff]   ;;  %v942_v58 = vld [vmem:[#allocation7 + $0x70] sm:$0xff]   ;;  %v946_v62 = vld [vmem:[#allocation7 + $0x78] sm:$0xff]  }
  0x4b   :  { %295 = vmatprep.subr.bf16.mxu0 %v899_v21  ;;  %338 = vmatprep.subr.bf16.mxu1 %v901_v22  ;;  %v943_v59 = vld [vmem:[#allocation7 + $0xf0] sm:$0xff]   ;;  %v947_v63 = vld [vmem:[#allocation7 + $0xf8] sm:$0xff]  }
  0x4c   :  { %v944_v60 = vld [vmem:[#allocation7 + $0x30] sm:$0xff]   ;;  %v948_v0 = vld [vmem:[#allocation7 + $0x38] sm:$0xff]  }
  0x4d   :  { %v945_v61 = vld [vmem:[#allocation7 + $0xb0] sm:$0xff]   ;;  %v949_v1 = vld [vmem:[#allocation7 + $0xb8] sm:$0xff]  }
  0x4e   :  { %296 = vmatpush1.bf16.msra.mxu0 %v903_v23  ;;  %339 = vmatpush1.bf16.msra.mxu1 %v904_v24  ;;  %v97_v6 = vld [vmem:[%s1141_s2] sm:$0xf] }
  0x4f   :  { %297 = vmatprep.subr.bf16.mxu0 %v905_v25  ;;  %340 = vmatprep.subr.bf16.mxu1 %v907_v26  ;;  %v102_v9 = vrot.slane %v97_v6, %v101_v4  ;;  %v110_v10 = vrot.slane %v97_v6, %v109_v5  ;;  %v106_v11 = vrot.slane %v97_v6, %v105_v7 }
  0x50   :  { %v114_v12 = vrot.slane %v97_v6, %v113_v8 }
  0x52   :  { %298 = vmatpush1.bf16.msra.mxu0 %v909_v27  ;;  %341 = vmatpush1.bf16.msra.mxu1 %v910_v28 }
  0x53   :  { %299 = vmatprep.subr.bf16.mxu0 %v911_v29  ;;  %342 = vmatprep.subr.bf16.mxu1 %v913_v30 }
  0x56   :  { %300 = vmatpush1.bf16.msra.mxu0 %v915_v31  ;;  %343 = vmatpush1.bf16.msra.mxu1 %v916_v32 }
  0x57   :  { %814 = vmatprep.subr.bf16.mxu0 %v918_v33  ;;  %836 = vmatprep.subr.bf16.mxu1 %v919_v35 }
  0x59   :  { %318 = vmatmul.mubr.bf16.vlgmr.msra.gmra.mrb[0].mxu0 %v917_v34  ;;  %361 = vmatmul.mubr.bf16.vlgmr.msra.gmra.mrb[0].mxu1 %v917_v34 }
  0x5a   :  { %815 = vmatpush3.bf16.msra.mxu0 %v920_v36  ;;  %837 = vmatpush3.bf16.msra.mxu1 %v921_v37 }
  0x5b   :  { %816 = vmatprep.subr.bf16.mxu0 %v922_v38  ;;  %838 = vmatprep.subr.bf16.mxu1 %v923_v39 }
  0x5e   :  { %817 = vmatpush3.bf16.msra.mxu0 %v924_v40  ;;  %839 = vmatpush3.bf16.msra.mxu1 %v925_v41 }
  0x5f   :  { %818 = vmatprep.subr.bf16.mxu0 %v926_v42  ;;  %840 = vmatprep.subr.bf16.mxu1 %v927_v43  ;;  %v781_v43 = vld [vmem:[%s1143_s4] ss:$0 sm:$0xff]  ;;  %s1016_s4 = scalar_lea.vmem %s736_s9, 256 }
  0x60   :  { %p1017_p10 = scmp.ne.s32.totalorder %s736_s9, %s1016_s4  ;;  %p1022_p12 = scmp.lt.s32.totalorder %s1016_s4, %s1016_s4 }
  0x62   :  { %819 = vmatpush3.bf16.msra.mxu0 %v928_v44  ;;  %841 = vmatpush3.bf16.msra.mxu1 %v929_v45  ;;  %p1023_p13 = por %p1022_p12, %p1021_p11 }
  0x63   :  { %820 = vmatprep.subr.bf16.mxu0 %v930_v46  ;;  %842 = vmatprep.subr.bf16.mxu1 %v931_v47 }
  0x64   :  { %p1024_p0 = pnand %p1023_p13, %p1017_p10 }
  0x66   :  { %821 = vmatpush3.bf16.msra.mxu0 %v932_v48  ;;  %843 = vmatpush3.bf16.msra.mxu1 %v933_v49 }
  0x67   :  { %822 = vmatprep.subr.bf16.mxu0 %v934_v50  ;;  %844 = vmatprep.subr.bf16.mxu1 %v935_v51 }
  0x6a   :  { %823 = vmatpush3.bf16.msra.mxu0 %v936_v52  ;;  %845 = vmatpush3.bf16.msra.mxu1 %v937_v53 }
  0x6b   :  { %824 = vmatprep.subr.bf16.mxu0 %v938_v54  ;;  %846 = vmatprep.subr.bf16.mxu1 %v939_v55 }
  0x6e   :  { %825 = vmatpush3.bf16.msra.mxu0 %v940_v56  ;;  %847 = vmatpush3.bf16.msra.mxu1 %v941_v57 }
  0x6f   :  { %826 = vmatprep.subr.bf16.mxu0 %v942_v58  ;;  %848 = vmatprep.subr.bf16.mxu1 %v943_v59 }
  0x72   :  { %827 = vmatpush3.bf16.msra.mxu0 %v944_v60  ;;  %849 = vmatpush3.bf16.msra.mxu1 %v945_v61 }
  0x73   :  { %828 = vmatprep.subr.bf16.mxu0 %v946_v62  ;;  %850 = vmatprep.subr.bf16.mxu1 %v947_v63 }
  0x76   :  { %829 = vmatpush3.bf16.msra.mxu0 %v948_v0  ;;  %851 = vmatpush3.bf16.msra.mxu1 %v949_v1 }
 0x12c   :  { %v319_v13 = vpop.f32.mrb[0].mxu0  ;;  %v362_v14 = vpop.f32.mrb[0].mxu1 }
 0x12d   :  { %v320_v15 = vadd.f32 %v319_v13, %v102_v9  ;;  %v363_v16 = vadd.f32 %v362_v14, %v110_v10  ;;  %v321_v17 = vpop.f32.mrb[1].mxu0  ;;  %v364_v18 = vpop.f32.mrb[1].mxu1 }
 0x12e   :  { %v322_v19 = vadd.f32 %v321_v17, %v106_v11  ;;  %v365_v20 = vadd.f32 %v364_v18, %v114_v12  ;;  %v323_v21 = vpop.f32.mrb[2].mxu0  ;;  %v366_v22 = vpop.f32.mrb[2].mxu1 }
 0x12f   :  { %v373_v23 = vmax.f32 %v363_v16, 0.0  ;;  %v324_v24 = vadd.f32 %v323_v21, %v102_v9  ;;  %v367_v25 = vadd.f32 %v366_v22, %v110_v10  ;;  %v325_v26 = vpop.f32.mrb[3].mxu0  ;;  %v368_v27 = vpop.f32.mrb[3].mxu1  ;;  %v371_v31 = vmax.f32 %v320_v15, 0.0 }
 0x130   :  { %v374_v28 = vmax.f32 %v365_v20, 0.0  ;;  %v326_v29 = vadd.f32 %v325_v26, %v106_v11  ;;  %v369_v30 = vadd.f32 %v368_v27, %v114_v12  ;;  %v372_v34 = vmax.f32 %v322_v19, 0.0 }
 0x131   :  { %v375_v32 = vmax.f32 %v324_v24, 0.0  ;;  %v377_v33 = vmax.f32 %v367_v25, 0.0 }
 0x132   :  { %v376_v35 = vmax.f32 %v326_v29, 0.0  ;;  %v378_v36 = vmax.f32 %v369_v30, 0.0 }
 0x133   :  { %v379_v37 = vpack.c.bf16 %v375_v32, %v371_v31  ;;  %v381_v38 = vpack.c.bf16 %v377_v33, %v373_v23 }
 0x134   :  { %v380_v39 = vpack.c.bf16 %v376_v35, %v372_v34  ;;  %v382_v40 = vpack.c.bf16 %v378_v36, %v374_v28 }
 0x136   :  { %678 = vmatprep.mubr.bf16.mxu0 %v380_v39  ;;  %719 = vmatprep.mubr.bf16.mxu1 %v382_v40 }
 0x137   :  { %679 = vmatmul.mubr.bf16.vlgmr.msra.gmra.mrb[4].mxu0 %v379_v37  ;;  %720 = vmatmul.mubr.bf16.vlgmr.msra.gmra.mrb[4].mxu1 %v381_v38 }
 0x20a   :  { %v830_v41 = vpop.f32.mrb[4].mxu0  ;;  %v852_v42 = vpop.f32.mrb[4].mxu1 }
 0x20b   :  { %v831_v44 = vpop.f32.mrb[5].mxu0  ;;  %v853_v45 = vpop.f32.mrb[5].mxu1 }
 0x20c   :  { %v832_v46 = vadd.f32 %v831_v44, %v830_v41  ;;  %v854_v47 = vadd.f32 %v853_v45, %v852_v42  ;;  %v833_v48 = vpop.f32.mrb[6].mxu0  ;;  %v855_v49 = vpop.f32.mrb[6].mxu1 }
 0x20d   :  { %v834_v50 = vpop.f32.mrb[7].mxu0  ;;  %v856_v51 = vpop.f32.mrb[7].mxu1 }
 0x20e   :  { %v681_v52 = vadd.f32 %v832_v46, %v781_v43  ;;  %v835_v53 = vadd.f32 %v834_v50, %v833_v48  ;;  %v857_v54 = vadd.f32 %v856_v51, %v855_v49 }
 0x210   :  { %v722_v55 = vadd.f32 %v854_v47, %v681_v52  ;;  %v684_v56 = vadd.f32 %v835_v53, %v781_v43 }
 0x212   :  { %728 = vst [vmem:[#allocation8] sm:$0xff] %v722_v55  ;;  %v725_v57 = vadd.f32 %v857_v54, %v684_v56 }
 0x214   :  { %729 = vst [vmem:[#allocation8 + $0x8] sm:$0xff] %v725_v57 }
 0x215   :  { %1027 = shalt.err (!%p1024_p0)
}
 0x216   :  { %s1028_s12 = scalar_lea.hbm %s1144_s5, 256 }
 0x217   :  { %p1029_p1 = scmp.ne.s32.totalorder %s1144_s5, %s1028_s12  ;;  %p1032_p2 = scmp.lt.u32.totalorder %s1028_s12, %s1144_s5 }
 0x219   :  { %p1034_p3 = pnand %p1032_p2, %p1029_p1 }
 0x21b   :  { %1037 = shalt.err (!%p1034_p3)
}
 0x21c   :  { %s1053_s1 = smov 128   ;;  %s1054_s17 = smov 8  }
 0x21d   :  { %741 = dma.vmem_to_hbm [thread:$0]  %s736_s9, 256, %s1144_s5, [#allocation4], %s1053_s1, %s1053_s1, %s1054_s17  }
 0x21e   :  { %1042 = dma.done.wait [#allocation4], 256  }
 0x21f   :  { %1043 = vsyncadd [#allocation4], 4294967040 }
 0x220   :  { %745 = vsyncpa [#allocation3], 1 }
 0x221   :  { %746 = vsyncpa [#allocation6], 1 }
 0x222   :  { %747 = vsyncpa [#allocation4], 1 }

</bundles_post_ra>
